<compile_context>
chip_gen: v5e
topology: v5e:2x2
jax: 0.10.0
libtpu: 0.0.40
codegen_flags: <defaults>
</compile_context>

<pallas_src>
import functools

import jax
import jax.numpy as jnp
from jax import lax
from jax.experimental import pallas as pl
from jax.experimental.pallas import tpu as pltpu


def _round_up(x, m):
    return ((x + m - 1) // m) * m


def _vmem_limit(need_bytes):
    return int(min(max(need_bytes + (4 << 20), 32 << 20), 64 << 20))


# -------- fused ReLU + global sum(relu(x)^2) + activated (bf16) copy --------

def _relu_act_sumsq_kernel(x_ref, act_ref, ss_ref, acc_ref, *, n_rows):
    i = pl.program_id(0)
    tr, d = x_ref.shape

    # Mask rows beyond the real input: a ragged last tile reads unspecified
    # data; zero it so it is inert through sumsq and the downstream matmul.
    row = lax.broadcasted_iota(jnp.int32, (tr, d), 0)
    valid = (i * tr + row) < n_rows
    x = jnp.where(valid, jnp.maximum(x_ref[...].astype(jnp.float32), 0.0), 0.0)

    # Activated features, written already padded to the matmul tiling.
    act_ref[...] = x.astype(act_ref.dtype)

    @pl.when(i == 0)
    def _():
        acc_ref[...] = jnp.zeros_like(acc_ref)
        ss_ref[...] = jnp.zeros_like(ss_ref)

    # VPU-only partial accumulation: reducing over the leading axis of
    # (tr//8, 8, d) is a chain of elementwise adds -- no per-step XLU reduce,
    # no serialized scalar read-modify-write in the hot loop.
    xx = x * x
    if tr == 8:
        acc_ref[...] += xx
    else:
        acc_ref[...] += jnp.sum(xx.reshape(tr // 8, 8, d), axis=0)

    # Single cross-sublane/lane reduce at the very end.
    @pl.when(i == pl.num_programs(0) - 1)
    def _():
        ss_ref[...] += jnp.sum(acc_ref[...])


def _pick_prepass_tile(row_tile, d, act_itemsize, budget=12 << 20):
    """Largest multiple-of-8 divisor of `row_tile` whose footprint
    (f32 input + act output, double-buffered, + (8,d) scratch) fits budget."""
    def fits(t):
        return t * d * (2 * 4 + 2 * act_itemsize) + 8 * d * 4 <= budget
    for t in range(row_tile, 7, -8):
        if row_tile % t == 0 and fits(t):
            return t
    return 8


def _relu_act_sumsq(x, pad_rows, row_tile, act_dtype):
    """One HBM pass over x. Returns (relu(x).astype(act_dtype) zero-padded to
    (pad_rows, d), sum(relu(x)**2) as an f32 scalar)."""
    n, d = x.shape
    act_itemsize = jnp.dtype(act_dtype).itemsize
    tr = _pick_prepass_tile(row_tile, d, act_itemsize)
    grid = pad_rows // tr
    in_blocks = pl.cdiv(n, tr)
    if grid > in_blocks:
        # Blocks fully past the input re-read the last in-bounds block (their
        # contents are masked to zero anyway) -> no out-of-bounds input DMA.
        x_map = lambda i: (jnp.minimum(i, in_blocks - 1), 0)
    else:
        x_map = lambda i: (i, 0)

    need = tr * d * (2 * 4 + 2 * act_itemsize) + 8 * d * 4
    act, ss = pl.pallas_call(
        functools.partial(_relu_act_sumsq_kernel, n_rows=n),
        out_shape=(jax.ShapeDtypeStruct((pad_rows, d), act_dtype),
                   jax.ShapeDtypeStruct((1, 1), jnp.float32)),
        grid=(grid,),
        in_specs=[pl.BlockSpec((tr, d), x_map)],
        out_specs=(pl.BlockSpec((tr, d), lambda i: (i, 0)),
                   pl.BlockSpec((1, 1), lambda i: (0, 0))),  # resident scalar
        scratch_shapes=[pltpu.VMEM((8, d), jnp.float32)],
        compiler_params=pltpu.CompilerParams(
            dimension_semantics=("arbitrary",),
            vmem_limit_bytes=_vmem_limit(need)),
    )(x)
    return act, ss[0, 0]


# ------------------------- scaled similarity matmul -------------------------

def _matchnet_matmul_kernel(scale_ref, img_ref, txt_ref, out_ref, acc_ref):
    k = pl.program_id(2)

    @pl.when(k == 0)
    def _():
        acc_ref[...] = jnp.zeros_like(acc_ref)

    # Contract the shared feat (lane) axis directly: imgs @ txts.T with no
    # transpose of txts in front of the MXU; accumulate in f32.
    acc_ref[...] += lax.dot_general(
        img_ref[...], txt_ref[...],
        dimension_numbers=(((1,), (1,)), ((), ())),
        preferred_element_type=jnp.float32,
    )

    @pl.when(k == pl.num_programs(2) - 1)
    def _():
        # Single scalar normalization (rsqrt(ss_img*ss_txt) precomputed),
        # applied once to the output tile instead of two full-tensor divides.
        out_ref[...] = (acc_ref[...] * scale_ref[0]).astype(out_ref.dtype)


def _pick_tk(d, cap=1024):
    """Feature-axis tile: full d when small/unaligned, otherwise the largest
    multiple-of-128 divisor of d that is <= cap (bounds VMEM for huge d)."""
    if d <= cap or d % 128 != 0:
        return d
    for t in range(cap, 127, -128):
        if d % t == 0:
            return t
    return d


def matchnet_forward(imgs_feats, txts_feats, *, tm=512, tn=256, tk_cap=1024,
                     use_bf16_matmul=True):
    n_img, d = imgs_feats.shape
    n_txt, d2 = txts_feats.shape
    assert d == d2, "feat_dims mismatch"

    act_dtype = jnp.bfloat16 if use_bf16_matmul else jnp.float32

    # Row tile (resident imgs block): big for arithmetic intensity, clamped to
    # the (padded) problem.  Column tile: multiple of 128 -> lane-dense stores.
    tm = min(tm, _round_up(n_img, 8))
    tn = min(tn, _round_up(n_txt, 128))
    # v7x megacore: if the row axis collapses to one block, split the column
    # axis so at least one "parallel" grid axis has >= 2 blocks.
    if pl.cdiv(n_img, tm) == 1:
        n_lane = _round_up(n_txt, 128)
        if n_lane // tn < 2 and n_lane >= 256:
            tn = max(128, ((n_lane // 2) // 128) * 128)

    m_pad = _round_up(n_img, tm)
    n_pad = _round_up(n_txt, tn)

    # One fused pass per tensor: ReLU + global sum-of-squares + activated bf16
    # copy (padded to the matmul tiling).  Raw f32 features are read exactly
    # once and never copied by an XLA pad.
    act_img, ss_img = _relu_act_sumsq(imgs_feats, m_pad, tm, act_dtype)
    act_txt, ss_txt = _relu_act_sumsq(txts_feats, n_pad, tn, act_dtype)

    # 1/(||relu(imgs)||_F * ||relu(txts)||_F) as one scalar (tiny XLA op).
    # rsqrt(0) = inf -> NaN output, matching the torch reference's 0/0.
    scale = lax.rsqrt(ss_img * ss_txt).astype(jnp.float32).reshape(1)

    tk = _pick_tk(d, tk_cap)
    grid = (m_pad // tm, n_pad // tn, d // tk)

    act_bytes = jnp.dtype(act_dtype).itemsize
    need = (2 * tm * tk * act_bytes + 2 * tn * tk * act_bytes
            + 2 * tm * tn * 4 + tm * tn * 4)

    # TODO(synk): if the streamed txts DMA is still exposed on v6e, add
    # pipeline_mode=pl.Buffered(3) on the txts BlockSpec (one extra tn x tk
    # tile of VMEM); and optionally emit a bf16 sim on v5e to halve writeback.
    sim = pl.pallas_call(
        _matchnet_matmul_kernel,
        out_shape=jax.ShapeDtypeStruct((m_pad, n_pad), jnp.float32),
        grid=grid,
        in_specs=[
            pl.BlockSpec(memory_space=pltpu.MemorySpace.SMEM),   # scale (1,)
            pl.BlockSpec((tm, tk), lambda i, j, k: (i, k)),      # imgs tile
            pl.BlockSpec((tn, tk), lambda i, j, k: (j, k)),      # txts tile
        ],
        out_specs=pl.BlockSpec((tm, tn), lambda i, j, k: (i, j)),
        scratch_shapes=[pltpu.VMEM((tm, tn), jnp.float32)],
        compiler_params=pltpu.CompilerParams(
            dimension_semantics=("parallel", "parallel", "arbitrary"),
            vmem_limit_bytes=_vmem_limit(need)),
    )(scale, act_img, act_txt)

    if (m_pad, n_pad) != (n_img, n_txt):
        sim = sim[:n_img, :n_txt]
    return sim


# --------------------------------- reference ---------------------------------

def matchnet_reference(imgs_feats, txts_feats):
    imgs = jnp.maximum(imgs_feats, 0.0)
    txts = jnp.maximum(txts_feats, 0.0)
    imgs = imgs / jnp.sqrt(jnp.sum(imgs * imgs))
    txts = txts / jnp.sqrt(jnp.sum(txts * txts))
    return imgs @ txts.T


if __name__ == "__main__":
    # MatchNet has no learned parameters (feat_dims is metadata only).
    key = jax.random.PRNGKey(0)
    k1, k2, k3, k4 = jax.random.split(key, 4)

    # Case 1: tile-aligned shapes.
    imgs_a = jax.random.normal(k1, (64, 256), dtype=jnp.float32)
    txts_a = jax.random.normal(k2, (128, 256), dtype=jnp.float32)
    # Case 2: ragged shapes (exercises in-kernel row masks / output padding).
    imgs_b = jax.random.normal(k3, (10, 96), dtype=jnp.float32)
    txts_b = jax.random.normal(k4, (20, 96), dtype=jnp.float32)

    for imgs, txts in ((imgs_a, txts_a), (imgs_b, txts_b)):
        ref = matchnet_reference(imgs, txts)

        # f32 MXU-operand path: near bit-exact vs the reference.
        sim_f32 = jax.block_until_ready(
            matchnet_forward(imgs, txts, use_bf16_matmul=False))
        assert sim_f32.shape == ref.shape
        assert jnp.allclose(sim_f32, ref, atol=1e-5, rtol=1e-5)

        # bf16 MXU-operand path (default perf mode, f32 accumulation).
        sim_bf16 = jax.block_until_ready(matchnet_forward(imgs, txts))
        assert sim_bf16.shape == ref.shape
        assert jnp.allclose(sim_bf16, ref, atol=2e-3, rtol=5e-2)

    print("KERNEL_OK")
</pallas_src>

<mosaic_0001>
module attributes {stable_mosaic.version = 11 : i64} {
  func.func @_relu_act_sumsq_kernel(%arg0: i32, %arg1: memref<64x256xf32, #tpu.memory_space<vmem>>, %arg2: memref<64x256xf32, #tpu.memory_space<vmem>>, %arg3: memref<1x1xf32, #tpu.memory_space<vmem>>, %arg4: memref<8x256xf32, #tpu.memory_space<vmem>>) attributes {dimension_semantics = [#tpu.dimension_semantics<arbitrary>], iteration_bounds = array<i64: 1>, scalar_prefetch = 0 : i64, scratch_operands = 1 : i64, tpu.core_type = #tpu.core_type<tc>, window_params = [{transform_indices = @transform_0, window_bounds = array<i64: 64, 256>}, {transform_indices = @transform_1, window_bounds = array<i64: 64, 256>}, {pipeline_mode = #tpu.pipeline_mode<synchronous>, transform_indices = @transform_2, window_bounds = array<i64: 1, 1>}]} {
    %0 = tpu.iota {dimensions = array<i32: 0>} : vector<64x256xi32>
    %c64_i32 = arith.constant 64 : i32
    %1 = arith.muli %arg0, %c64_i32 : i32
    %2 = vector.broadcast %1 : i32 to vector<64x256xi32>
    %3 = arith.addi %2, %0 : vector<64x256xi32>
    %c64_i32_0 = arith.constant 64 : i32
    %4 = vector.broadcast %c64_i32_0 : i32 to vector<64x256xi32>
    %5 = arith.cmpi slt, %3, %4 : vector<64x256xi32>
    %c0 = arith.constant 0 : index
    %c0_1 = arith.constant 0 : index
    %6 = vector.load %arg1[%c0, %c0_1] : memref<64x256xf32, #tpu.memory_space<vmem>>, vector<64x256xf32>
    %cst = arith.constant 0.000000e+00 : f32
    %7 = vector.broadcast %cst : f32 to vector<64x256xf32>
    %8 = arith.maximumf %6, %7 : vector<64x256xf32>
    %cst_2 = arith.constant 0.000000e+00 : f32
    %9 = vector.broadcast %cst_2 : f32 to vector<64x256xf32>
    %10 = arith.select %5, %8, %9 : vector<64x256xi1>, vector<64x256xf32>
    %c0_3 = arith.constant 0 : index
    %c0_4 = arith.constant 0 : index
    %11 = vector.load %arg2[%c0_3, %c0_4] : memref<64x256xf32, #tpu.memory_space<vmem>>, vector<64x256xf32>
    tpu.vector_store %arg2[%c0_3, %c0_4], %10 {strides = array<i32>} : memref<64x256xf32, #tpu.memory_space<vmem>>, vector<64x256xf32>,
    %c0_i32 = arith.constant 0 : i32
    %12 = arith.cmpi eq, %arg0, %c0_i32 : i32
    %13 = arith.extui %12 : i1 to i32
    %c0_i32_5 = arith.constant 0 : i32
    %14 = arith.cmpi ne, %13, %c0_i32_5 : i32
    scf.if %14 {
      %cst_13 = arith.constant 0.000000e+00 : f32
      %24 = vector.broadcast %cst_13 : f32 to vector<8x256xf32>
      %c0_14 = arith.constant 0 : index
      %c0_15 = arith.constant 0 : index
      %25 = vector.load %arg4[%c0_14, %c0_15] : memref<8x256xf32, #tpu.memory_space<vmem>>, vector<8x256xf32>
      tpu.vector_store %arg4[%c0_14, %c0_15], %24 {strides = array<i32>} : memref<8x256xf32, #tpu.memory_space<vmem>>, vector<8x256xf32>,
      %cst_16 = arith.constant 0.000000e+00 : f32
      %26 = vector.broadcast %cst_16 : f32 to vector<1x1xf32>
      %c0_17 = arith.constant 0 : index
      %c0_18 = arith.constant 0 : index
      %27 = vector.load %arg3[%c0_17, %c0_18] : memref<1x1xf32, #tpu.memory_space<vmem>>, vector<1x1xf32>
      tpu.vector_store %arg3[%c0_17, %c0_18], %26 {strides = array<i32>} : memref<1x1xf32, #tpu.memory_space<vmem>>, vector<1x1xf32>,
    } else {
    }
    %15 = arith.mulf %10, %10 : vector<64x256xf32>
    %c0_6 = arith.constant 0 : index
    %c0_7 = arith.constant 0 : index
    %16 = vector.load %arg4[%c0_6, %c0_7] : memref<8x256xf32, #tpu.memory_space<vmem>>, vector<8x256xf32>
    %17 = vector.shape_cast %15 : vector<64x256xf32> to vector<8x8x256xf32>
    %cst_8 = arith.constant dense<0.000000e+00> : vector<8x256xf32>
    %18 = vector.multi_reduction <add>, %17, %cst_8 [0] : vector<8x8x256xf32> to vector<8x256xf32>
    %19 = arith.addf %16, %18 : vector<8x256xf32>
    %c0_9 = arith.constant 0 : index
    %c0_10 = arith.constant 0 : index
    %20 = vector.load %arg4[%c0_9, %c0_10] : memref<8x256xf32, #tpu.memory_space<vmem>>, vector<8x256xf32>
    tpu.vector_store %arg4[%c0_9, %c0_10], %19 {strides = array<i32>} : memref<8x256xf32, #tpu.memory_space<vmem>>, vector<8x256xf32>,
    %c0_i32_11 = arith.constant 0 : i32
    %21 = arith.cmpi eq, %arg0, %c0_i32_11 : i32
    %22 = arith.extui %21 : i1 to i32
    %c0_i32_12 = arith.constant 0 : i32
    %23 = arith.cmpi ne, %22, %c0_i32_12 : i32
    scf.if %23 {
      %c0_13 = arith.constant 0 : index
      %c0_14 = arith.constant 0 : index
      %24 = vector.load %arg3[%c0_13, %c0_14] : memref<1x1xf32, #tpu.memory_space<vmem>>, vector<1x1xf32>
      %c0_15 = arith.constant 0 : index
      %c0_16 = arith.constant 0 : index
      %25 = vector.load %arg4[%c0_15, %c0_16] : memref<8x256xf32, #tpu.memory_space<vmem>>, vector<8x256xf32>
      %26 = vector.shape_cast %25 : vector<8x256xf32> to vector<1x8x256xf32>
      %cst_17 = arith.constant dense<0.000000e+00> : vector<1xf32>
      %27 = vector.multi_reduction <add>, %26, %cst_17 [1, 2] : vector<1x8x256xf32> to vector<1xf32>
      %28 = vector.shape_cast %27 : vector<1xf32> to vector<1x1x1xf32>
      %29 = vector.extract %28[0, 0, 0] : f32 from vector<1x1x1xf32>
      %30 = vector.broadcast %29 : f32 to vector<1x1xf32>
      %31 = arith.addf %24, %30 : vector<1x1xf32>
      %c0_18 = arith.constant 0 : index
      %c0_19 = arith.constant 0 : index
      %32 = vector.load %arg3[%c0_18, %c0_19] : memref<1x1xf32, #tpu.memory_space<vmem>>, vector<1x1xf32>
      tpu.vector_store %arg3[%c0_18, %c0_19], %31 {strides = array<i32>} : memref<1x1xf32, #tpu.memory_space<vmem>>, vector<1x1xf32>,
    } else {
    }
    return
  }
  func.func @transform_0(%arg0: i32) -> (i32, i32) {
    %c0_i32 = arith.constant 0 : i32
    %c0_i32_0 = arith.constant 0 : i32
    return %arg0, %c0_i32 : i32, i32
  }
  func.func @transform_1(%arg0: i32) -> (i32, i32) {
    %c0_i32 = arith.constant 0 : i32
    %c0_i32_0 = arith.constant 0 : i32
    return %arg0, %c0_i32 : i32, i32
  }
  func.func @transform_2(%arg0: i32) -> (i32, i32) {
    %c0_i32 = arith.constant 0 : i32
    %c0_i32_0 = arith.constant 0 : i32
    %c0_i32_1 = arith.constant 0 : i32
    return %c0_i32, %c0_i32_0 : i32, i32
  }
}

</mosaic_0001>

<bundles_post_ra>
// kernel: tpu_custom_call.1
= control target key start
LH: loop header
LB: loop body
LE: loop exit
PB: predicated region body
PF: predicated region fallthrough
CT: control target
= control target key end

     0   :  { %8 = vsyncpa [#allocation4], 0  ;;  %s342_s0 = inlined_call_operand.hbm [shape: f32[64,256], index: 0, kind: input, shape index: {}]   ;;  %s343_s1 = inlined_call_operand.hbm [shape: f32[64,256], index: 1, kind: output, shape index: {0}]   ;;  %s344_s2 = inlined_call_operand.hbm [shape: f32[1,1], index: 2, kind: output, shape index: {1}]  }
   0x1   :  { %9 = vsyncpa [#allocation5], 0 }
   0x2   :  { %10 = vsyncpa [#allocation8], 0  ;;  %s15_s11 = sshll.u32 %s342_s0, 4  ;;  %s304_s12 = smov [#allocation3]   ;;  %s16_s11 = int_to_ptr.hbm [resolvable:$true] %s15_s11 }
   0x3   :  { %s17_s13 = sshll.u32 %s304_s12, 4  ;;  %s305_s14 = smov 256   ;;  %s18_s13 = int_to_ptr.vmem [resolvable:$true] %s17_s13 }
   0x4   :  { %s306_s15 = smov 16  }
   0x5   :  { %23 = dma.hbm_to_vmem [thread:$0]  %s16_s11, 2048, %s18_s13, [#allocation4], %s305_s14, %s305_s14, %s306_s15  }
   0x6   :  { %298 = dma.done.wait [#allocation4], 2048  }
   0x7   :  { %299 = vsyncadd [#allocation4], 4294965248  ;;  %v55_v0 = vld [vmem:[#allocation3] sm:$0xff]  ;;  %v56_v1 = vld [vmem:[#allocation3 + $0x8] sm:$0xff]  ;;  %s307_s0 = smov [#allocation6]   ;;  %s189_s19 = sshll.u32 %s343_s1, 4  ;;  %s190_s19 = int_to_ptr.hbm [resolvable:$true] %s189_s19 }
   0x8   :  { %v57_v2 = vld [vmem:[#allocation3 + $0x10] sm:$0xff]  ;;  %v58_v3 = vld [vmem:[#allocation3 + $0x18] sm:$0xff]  ;;  %v59_v4 = vld [vmem:[#allocation3 + $0x20] sm:$0xff]  ;;  %v71_v6 = vmax.f32 %v55_v0, 0.0  ;;  %v72_v7 = vmax.f32 %v56_v1, 0.0  ;;  %s187_s16 = sshll.u32 %s307_s0, 4  ;;  %s188_s16 = int_to_ptr.vmem [resolvable:$true] %s187_s16 }
   0x9   :  { %v60_v5 = vld [vmem:[#allocation3 + $0x28] sm:$0xff]  ;;  %v73_v8 = vmax.f32 %v57_v2, 0.0  ;;  %v61_v9 = vld [vmem:[#allocation3 + $0x30] sm:$0xff]  ;;  %v62_v10 = vld [vmem:[#allocation3 + $0x38] sm:$0xff]  ;;  %v74_v11 = vmax.f32 %v58_v3, 0.0  ;;  %v75_v12 = vmax.f32 %v59_v4, 0.0 }
   0xa   :  { %v76_v13 = vmax.f32 %v60_v5, 0.0  ;;  %v63_v14 = vld [vmem:[#allocation3 + $0x40] sm:$0xff]  ;;  %v64_v15 = vld [vmem:[#allocation3 + $0x48] sm:$0xff]  ;;  %v77_v16 = vmax.f32 %v61_v9, 0.0  ;;  %v65_v17 = vld [vmem:[#allocation3 + $0x50] sm:$0xff]  ;;  %v78_v19 = vmax.f32 %v62_v10, 0.0  ;;  %v127_v20 = vmul.f32 %v71_v6, %v71_v6 }
   0xb   :  { %v66_v18 = vld [vmem:[#allocation3 + $0x58] sm:$0xff]  ;;  %103 = vst [vmem:[#allocation6] sm:$0xff] %v71_v6  ;;  %v128_v21 = vmul.f32 %v72_v7, %v72_v7  ;;  %v129_v22 = vmul.f32 %v73_v8, %v73_v8  ;;  %v130_v23 = vmul.f32 %v74_v11, %v74_v11  ;;  %v67_v24 = vld [vmem:[#allocation3 + $0x60] sm:$0xff]  ;;  %v68_v25 = vld [vmem:[#allocation3 + $0x68] sm:$0xff]  ;;  %v79_v26 = vmax.f32 %v63_v14, 0.0  ;;  %s309_s1 = smov [#allocation7]  }
   0xc   :  { %104 = vst [vmem:[#allocation6 + $0x8] sm:$0xff] %v72_v7  ;;  %v80_v27 = vmax.f32 %v64_v15, 0.0  ;;  %v131_v28 = vmul.f32 %v75_v12, %v75_v12  ;;  %v132_v29 = vmul.f32 %v76_v13, %v76_v13  ;;  %v81_v30 = vmax.f32 %v65_v17, 0.0  ;;  %v69_v32 = vld [vmem:[#allocation3 + $0x70] sm:$0xff]  ;;  %v70_v33 = vld [vmem:[#allocation3 + $0x78] sm:$0xff]  ;;  %s201_s20 = sshll.u32 %s309_s1, 4  ;;  %s202_s20 = int_to_ptr.vmem [resolvable:$true] %s201_s20 }
   0xd   :  { %105 = vst [vmem:[#allocation6 + $0x10] sm:$0xff] %v73_v8  ;;  %v82_v31 = vmax.f32 %v66_v18, 0.0  ;;  %v133_v34 = vmul.f32 %v77_v16, %v77_v16  ;;  %v134_v35 = vmul.f32 %v78_v19, %v78_v19  ;;  %v145_v36 = vadd.f32 %v129_v22, %v127_v20  ;;  %s203_s23 = sshll.u32 %s344_s2, 4  ;;  %s204_s23 = int_to_ptr.hbm [resolvable:$true] %s203_s23 }
   0xe   :  { %106 = vst [vmem:[#allocation6 + $0x18] sm:$0xff] %v74_v11  ;;  %v152_v37 = vadd.f32 %v130_v23, %v128_v21  ;;  %v83_v38 = vmax.f32 %v67_v24, 0.0  ;;  %v84_v39 = vmax.f32 %v68_v25, 0.0  ;;  %v135_v40 = vmul.f32 %v79_v26, %v79_v26 }
   0xf   :  { %107 = vst [vmem:[#allocation6 + $0x20] sm:$0xff] %v75_v12  ;;  %v136_v41 = vmul.f32 %v80_v27, %v80_v27  ;;  %v146_v42 = vadd.f32 %v145_v36, %v131_v28  ;;  %v85_v44 = vmax.f32 %v69_v32, 0.0  ;;  %v86_v45 = vmax.f32 %v70_v33, 0.0 }
  0x10   :  { %108 = vst [vmem:[#allocation6 + $0x28] sm:$0xff] %v76_v13  ;;  %v153_v43 = vadd.f32 %v152_v37, %v132_v29  ;;  %v137_v46 = vmul.f32 %v81_v30, %v81_v30  ;;  %v138_v47 = vmul.f32 %v82_v31, %v82_v31  ;;  %v139_v50 = vmul.f32 %v83_v38, %v83_v38 }
  0x11   :  { %109 = vst [vmem:[#allocation6 + $0x30] sm:$0xff] %v77_v16  ;;  %v147_v48 = vadd.f32 %v146_v42, %v133_v34  ;;  %v140_v51 = vmul.f32 %v84_v39, %v84_v39  ;;  %v141_v54 = vmul.f32 %v85_v44, %v85_v44  ;;  %v142_v55 = vmul.f32 %v86_v45, %v86_v45 }
  0x12   :  { %110 = vst [vmem:[#allocation6 + $0x38] sm:$0xff] %v78_v19  ;;  %v154_v49 = vadd.f32 %v153_v43, %v134_v35  ;;  %vm125_vm0 = vcmask 0   ;;  %v308_v63 = vmov 0.0  }
  0x13   :  { %111 = vst [vmem:[#allocation6 + $0x40] sm:$0xff] %v79_v26  ;;  %v148_v52 = vadd.f32 %v147_v48, %v135_v40 }
  0x14   :  { %112 = vst [vmem:[#allocation6 + $0x48] sm:$0xff] %v80_v27  ;;  %v155_v53 = vadd.f32 %v154_v49, %v136_v41 }
  0x15   :  { %113 = vst [vmem:[#allocation6 + $0x50] sm:$0xff] %v81_v30  ;;  %v149_v56 = vadd.f32 %v148_v52, %v137_v46 }
  0x16   :  { %114 = vst [vmem:[#allocation6 + $0x58] sm:$0xff] %v82_v31  ;;  %v156_v57 = vadd.f32 %v155_v53, %v138_v47 }
  0x17   :  { %115 = vst [vmem:[#allocation6 + $0x60] sm:$0xff] %v83_v38  ;;  %v150_v58 = vadd.f32 %v149_v56, %v139_v50 }
  0x18   :  { %116 = vst [vmem:[#allocation6 + $0x68] sm:$0xff] %v84_v39  ;;  %v157_v59 = vadd.f32 %v156_v57, %v140_v51 }
  0x19   :  { %117 = vst [vmem:[#allocation6 + $0x70] sm:$0xff] %v85_v44  ;;  %v151_v60 = vadd.f32 %v150_v58, %v141_v54 }
  0x1a   :  { %118 = vst [vmem:[#allocation6 + $0x78] sm:$0xff] %v86_v45  ;;  %v158_v61 = vadd.f32 %v157_v59, %v142_v55 }
  0x1b   :  { %195 = dma.vmem_to_hbm [thread:$0]  %s188_s16, 2048, %s190_s19, [#allocation5], %s305_s14, %s305_s14, %s306_s15   ;;  %126 = vst.msk [vmem:[#allocation7] sm:$0x1] %vm125_vm0, %v308_v63 }
  0x1c   :  { %v169_v62 = vadd.f32 %v158_v61, %v151_v60 }
  0x1e   :  { %170 = vadd.xlane.f32.xlu0 %v169_v62 }
  0x22   :  { %v166_v7 = vld [vmem:[#allocation7] sm:$0x1] }
  0x91   :  { %v171_v0 = vpop.xlane.xlu0 %170 }
  0x92   :  { %v172_v1 = vrot.slane %v171_v0, 4 }
  0x94   :  { %v173_v2 = vadd.f32 %v172_v1, %v171_v0 }
  0x96   :  { %v174_v3 = vrot.slane %v173_v2, 2 }
  0x98   :  { %v175_v4 = vadd.f32 %v174_v3, %v173_v2 }
  0x9a   :  { %v176_v5 = vrot.slane %v175_v4, 1 }
  0x9c   :  { %v177_v6 = vadd.f32 %v176_v5, %v175_v4 }
  0x9e   :  { %218 = vpush %v177_v6 }
  0xcf   :  { %s219_s24 = spop %218 }
  0xd0   :  { %v179_v8 = vstv %s219_s24 }
  0xd1   :  { %v180_v9 = vadd.f32 %v179_v8, %v166_v7 }
  0xd3   :  { %182 = vst.msk [vmem:[#allocation7] sm:$0x1] %vm125_vm0, %v180_v9 }
  0xd4   :  { %206 = dma.vmem_to_hbm [thread:$0]  %s202_s20, 16, %s204_s23, [#allocation8]  }
  0xd5   :  { %300 = dma.done.wait [#allocation5], 2048  }
  0xd6   :  { %301 = vsyncadd [#allocation5], 4294965248 }
  0xd7   :  { %302 = dma.done.wait [#allocation8], 16  }
  0xd8   :  { %303 = vsyncadd [#allocation8], 4294967280 }
  0xd9   :  { %215 = vsyncpa [#allocation4], 1 }
  0xda   :  { %216 = vsyncpa [#allocation5], 1 }
  0xdb   :  { %217 = vsyncpa [#allocation8], 1 }

</bundles_post_ra>
